<compile_context>
chip_gen: v7x
topology: tpu7x:2x2x1
jax: 0.10.0
libtpu: 0.0.40
codegen_flags: <defaults>
</compile_context>

<pallas_src>
import jax
import jax.numpy as jnp
from jax.experimental import pallas as pl
from jax.experimental.pallas import tpu as pltpu


def _mix_images_kernel(lam_ref, x_ref, xo_ref):
    # lam_ref : SMEM (1,) float32 — effective lambda (1.0 when not applied)
    # x_ref   : VMEM (B, TILE_D) float32 tile of the flattened NCHW batch
    # xo_ref  : VMEM (B, TILE_D) float32 tile of the mixed batch
    lam = lam_ref[0]
    x = x_ref[...]
    b = x.shape[0]
    if b % 8 == 0:
        # torch.roll(shift=1, dim=0): row i of the result is row (i-1) % B.
        # Sublane rotation runs on the XLU slot — essentially free next to the
        # VALU mix, no extra VMEM copies.
        x_rolled = pltpu.roll(x, shift=1, axis=0)
    else:
        # Small / sublane-unaligned batch: slice+concat roll (still correct).
        x_rolled = jnp.concatenate([x[-1:, :], x[:-1, :]], axis=0)
    xo_ref[...] = lam * x + (1.0 - lam) * x_rolled


def _mix_targets_kernel(lam_ref, tgt_ref, to_ref):
    # lam_ref : SMEM (1,) float32
    # tgt_ref : VMEM (B, 1) int32 class indices
    # to_ref  : VMEM (B, NC) float32 mixed one-hot targets
    lam = lam_ref[0]
    b, nc = to_ref.shape
    classes = jax.lax.broadcasted_iota(jnp.int32, (b, nc), 1)
    onehot = (classes == tgt_ref[...]).astype(to_ref.dtype)
    onehot_rolled = jnp.concatenate([onehot[-1:, :], onehot[:-1, :]], axis=0)
    to_ref[...] = lam * onehot + (1.0 - lam) * onehot_rolled


def _choose_tile_d(B, D, vmem_budget_bytes=24 << 20):
    """Largest lane-dense tile whose double-buffered in+out fits the budget."""
    # f32 input + f32 output, each double-buffered: 16 bytes per element-row.
    max_tile = (vmem_budget_bytes // (16 * B)) // 128 * 128
    max_tile = max(max_tile, 128)
    if D <= max_tile:
        return D  # single full-extent block (allowed even if D % 128 != 0)
    return max_tile


def random_mixup(batch, target, key, *, num_classes, p=0.5, alpha=1.0,
                 tile_d=None):
    """Pallas implementation of RandomMixup.forward.

    Args:
      batch:  (B, C, H, W) float32
      target: (B,) int32 class indices
      key:    jax.random.PRNGKey driving the (apply, lambda) draws
    Returns:
      (mixed_batch (B, C, H, W) float32, mixed_target (B, num_classes) float32)
    """
    if batch.ndim != 4:
        raise ValueError(f"Batch ndim should be 4. Got {batch.ndim}")
    if target.ndim != 1:
        raise ValueError(f"Target ndim should be 1. Got {target.ndim}")
    if num_classes < 1:
        raise ValueError(f"Invalid num_classes={num_classes}")
    if alpha <= 0:
        raise ValueError("Alpha param can't be zero.")

    B, C, H, W = batch.shape
    D = C * H * W

    k_apply, k_lam = jax.random.split(key)
    # torch.rand(1).item() >= p -> skip; so "apply" when uniform < p.
    applied = jax.random.uniform(k_apply, ()) < p
    # lambda ~ Beta(alpha, alpha) (first coord of Dirichlet([alpha, alpha])).
    lam = jax.random.beta(k_lam, alpha, alpha).astype(jnp.float32)
    # When not applied, lam_eff = 1 makes lam*x + (1-lam)*rolled == x, matching
    # the PyTorch early return (the target one-hot still happens either way).
    lam_eff = jnp.where(applied, lam, jnp.float32(1.0)).reshape((1,))

    x_flat = batch.reshape(B, D).astype(jnp.float32)

    if tile_d is None:
        tile_d = _choose_tile_d(B, D)
    if tile_d != D and tile_d % 128 != 0:
        raise ValueError(f"tile_d must be a multiple of 128 (got {tile_d})")
    grid = (pl.cdiv(D, tile_d),)

    # ---- hot path: lane-dense, D-tiled, pipelined image mix --------------
    xo_flat = pl.pallas_call(
        _mix_images_kernel,
        out_shape=jax.ShapeDtypeStruct((B, D), jnp.float32),
        grid=grid,
        in_specs=[
            pl.BlockSpec(memory_space=pltpu.MemorySpace.SMEM),     # lam_eff
            pl.BlockSpec((B, tile_d), lambda j: (0, j)),           # batch tile
        ],
        out_specs=pl.BlockSpec((B, tile_d), lambda j: (0, j)),
        compiler_params=pltpu.CompilerParams(
            # D tiles are independent -> megacore sharding on v7x, no-op else.
            dimension_semantics=("parallel",),
            # Explicit limit: above v5e's 16 MiB default, within v7x's 64 MiB.
            vmem_limit_bytes=32 * 1024 * 1024,
        ),
    )(lam_eff, x_flat)

    # ---- cold path: tiny one-hot + mix of the targets --------------------
    tgt_2d = target.astype(jnp.int32).reshape(B, 1)
    to = pl.pallas_call(
        _mix_targets_kernel,
        out_shape=jax.ShapeDtypeStruct((B, num_classes), jnp.float32),
        in_specs=[
            pl.BlockSpec(memory_space=pltpu.MemorySpace.SMEM),     # lam_eff
            pl.BlockSpec(memory_space=pltpu.MemorySpace.VMEM),     # targets
        ],
        out_specs=pl.BlockSpec(memory_space=pltpu.MemorySpace.VMEM),
    )(lam_eff, tgt_2d)

    return xo_flat.reshape(B, C, H, W), to


if __name__ == "__main__":
    NUM_CLASSES = 10
    P = 0.5
    ALPHA = 1.0

    key = jax.random.PRNGKey(0)
    k_x, k_t, k_mix = jax.random.split(key, 3)

    B, C, H, W = 2, 4, 16, 16
    batch = jax.random.normal(k_x, (B, C, H, W), dtype=jnp.float32)
    target = jax.random.randint(k_t, (B,), 0, NUM_CLASSES, dtype=jnp.int32)

    # tile_d=256 forces a 4-step D grid at this toy shape so the tiled /
    # pipelined path is exercised (production shapes pick tile_d automatically).
    mixed_batch, mixed_target = random_mixup(
        batch, target, k_mix, num_classes=NUM_CLASSES, p=P, alpha=ALPHA,
        tile_d=256,
    )
    jax.block_until_ready((mixed_batch, mixed_target))

    # Sanity check against a pure-JAX reference (same lambda / apply draws).
    k_apply, k_lam = jax.random.split(k_mix)
    applied = jax.random.uniform(k_apply, ()) < P
    lam = jax.random.beta(k_lam, ALPHA, ALPHA).astype(jnp.float32)
    lam_eff = jnp.where(applied, lam, 1.0)
    onehot = jax.nn.one_hot(target, NUM_CLASSES, dtype=jnp.float32)
    ref_batch = lam_eff * batch + (1.0 - lam_eff) * jnp.roll(batch, 1, axis=0)
    ref_target = lam_eff * onehot + (1.0 - lam_eff) * jnp.roll(onehot, 1, axis=0)
    assert jnp.allclose(mixed_batch, ref_batch, atol=1e-6)
    assert jnp.allclose(mixed_target, ref_target, atol=1e-6)

    print("KERNEL_OK")
</pallas_src>

<mosaic_0001>
module attributes {stable_mosaic.version = 11 : i64} {
  func.func @_mix_images_kernel(%arg0: i32, %arg1: memref<1xf32, #tpu.memory_space<smem>>, %arg2: memref<2x256xf32, #tpu.memory_space<vmem>>, %arg3: memref<2x256xf32, #tpu.memory_space<vmem>>) attributes {dimension_semantics = [#tpu.dimension_semantics<parallel>], iteration_bounds = array<i64: 4>, scalar_prefetch = 0 : i64, scratch_operands = 0 : i64, tpu.core_type = #tpu.core_type<tc>, window_params = [{transform_indices = @transform_0, window_bounds = array<i64: 1>}, {transform_indices = @transform_1, window_bounds = array<i64: 2, 256>}, {transform_indices = @transform_2, window_bounds = array<i64: 2, 256>}]} {
    %c0 = arith.constant 0 : index
    %0 = memref.load %arg1[%c0] : memref<1xf32, #tpu.memory_space<smem>>
    %c0_0 = arith.constant 0 : index
    %c0_1 = arith.constant 0 : index
    %1 = vector.load %arg2[%c0_0, %c0_1] : memref<2x256xf32, #tpu.memory_space<vmem>>, vector<2x256xf32>
    %2 = vector.extract_strided_slice %1 {offsets = [1, 0], sizes = [1, 256], strides = [1, 1]} : vector<2x256xf32> to vector<1x256xf32>
    %3 = vector.extract_strided_slice %1 {offsets = [0, 0], sizes = [1, 256], strides = [1, 1]} : vector<2x256xf32> to vector<1x256xf32>
    %4 = tpu.concatenate %2, %3 in 0 : vector<1x256xf32>, vector<1x256xf32> -> vector<2x256xf32>
    %5 = vector.broadcast %0 : f32 to vector<2x256xf32>
    %6 = arith.mulf %5, %1 : vector<2x256xf32>
    %cst = arith.constant 1.000000e+00 : f32
    %7 = arith.subf %cst, %0 : f32
    %8 = vector.broadcast %7 : f32 to vector<2x256xf32>
    %9 = arith.mulf %8, %4 : vector<2x256xf32>
    %10 = arith.addf %6, %9 : vector<2x256xf32>
    %c0_2 = arith.constant 0 : index
    %c0_3 = arith.constant 0 : index
    %11 = vector.load %arg3[%c0_2, %c0_3] : memref<2x256xf32, #tpu.memory_space<vmem>>, vector<2x256xf32>
    tpu.vector_store %arg3[%c0_2, %c0_3], %10 {strides = array<i32>} : memref<2x256xf32, #tpu.memory_space<vmem>>, vector<2x256xf32>,
    return
  }
  func.func @transform_0(%arg0: i32) -> i32 {
    %c0_i32 = arith.constant 0 : i32
    %c0_i32_0 = arith.constant 0 : i32
    return %c0_i32 : i32
  }
  func.func @transform_1(%arg0: i32) -> (i32, i32) {
    %c0_i32 = arith.constant 0 : i32
    %c0_i32_0 = arith.constant 0 : i32
    return %c0_i32, %arg0 : i32, i32
  }
  func.func @transform_2(%arg0: i32) -> (i32, i32) {
    %c0_i32 = arith.constant 0 : i32
    %c0_i32_0 = arith.constant 0 : i32
    return %c0_i32, %arg0 : i32, i32
  }
}

</mosaic_0001>

<bundles_post_ra>
// kernel: tpu_custom_call.1
= control target key start
LH: loop header
LB: loop body
LE: loop exit
PB: predicated region body
PF: predicated region fallthrough
CT: control target
= control target key end

     0   :  { %s638_s0 = inlined_call_operand.<no memory space> [shape: f32[1], index: 0, kind: input, shape index: {}]   ;;  %s639_s1 = inlined_call_operand.hbm [shape: f32[2,1024], index: 1, kind: input, shape index: {}]   ;;  %s640_s2 = inlined_call_operand.hbm [shape: f32[2,1024], index: 2, kind: output, shape index: {}]  }
   0x1   :  { %7 = sst [smem:[#allocation2]] %s638_s0 }
   0x2   :  { %8 = vsyncpa [#allocation4], 0 }
   0x3   :  { %10 = vsyncpa [#allocation4 + $0x1], 0 }
   0x4   :  { %11 = vsyncpa [#allocation5], 0 }
   0x5   :  { %13 = vsyncpa [#allocation5 + $0x1], 0  ;;  %s475_s11 = smov 0   ;;  %s477_s12 = smov 0  }
   0x6   :  { %s479_s13 = smov 0   ;;  %s481_s14 = smov 0  }
   0x7 LB: > { %s496_s0 = sadd.s32 4294967295, %s452_s14   ;;  %s293_s15 = sadd.s32 4294967294, %s452_s14   ;;  %s452_s14 = sphi %s481_s14, %s654_s14   ;;  %s448_s13 = sphi %s479_s13, %s653_s13   ;;  %s444_s12 = sphi %s477_s12, %s652_s12   ;;  %s440_s11 = sphi %s475_s11, %s651_s11  }
   0x8   : > { %s500_s16 = sadd.s32 1, %s452_s14   ;;  %s47_s17 = sadd.s32 1, %s448_s13 }
   0x9   : > { %s44_s18 = ssub.s32 %s452_s14, %s500_s16  ;;  %p54_p0 = scmp.ne.s32.totalorder %s448_s13, %s444_s12 }
   0xa   : > { %p45_p1 = scmp.eq.s32.totalorder %s44_s18, 0  ;;  %p55_p2 = scmp.eq.s32.totalorder %s452_s14, 0 }
   0xb   : > { %p60_p3 = scmp.ne.s32.totalorder %s444_s12, %s440_s11  ;;  %p61_p4 = scmp.eq.s32.totalorder %s496_s0, 0 }
   0xc   : > { %s512_s19 = scalar_select %p45_p1, %s448_s13, %s47_s17  }
   0xd   : > { %p514_p5 = por %p55_p2, %p54_p0  ;;  %p518_p6 = por %p61_p4, %p60_p3 }
   0xe   : > { %p84_p7 = scmp.eq.s32.totalorder %s496_s0, 3  ;;  %p90_p8 = scmp.eq.s32.totalorder %s293_s15, 3 }
   0xf   : > { %p321_p9 = scmp.lt.s32.totalorder %s452_s14, 4  ;;  %s113_s24 = sand.u32 1, %s448_s13  }
  0x10   : > { %p524_p10 = por %p84_p7, %p54_p0  ;;  %p528_p11 = por %p90_p8, %p60_p3 }
  0x11   : > { %s307_s25 = sshll.u32 %s452_s14, 6  ;;  %s296_s26 = sshll.u32 %s113_s24, 2 }
  0x12   : > { %s644_s22 = scalar_select %p524_p10, 1, 0 }
  0x13   : > { %s645_s23 = scalar_select %p528_p11, 1, 0 }
  0x14   : > { %s537_s29 = scalar_lea.hbm %s639_s1, %s307_s25  ;;  %s117_s30 = scalar_lea.vmem [#allocation3], %s296_s26 }
  0x15   : > { %s125_s3 = sshll.u32 %s117_s30, 4  ;;  %p541_p12 = pnand %p321_p9, %p514_p5  ;;  %s545_s3 = int_to_ptr.vmem [resolvable:$true] %s125_s3 }
  0x16   : > { %s114_s5 = scalar_lea.sflag [#allocation4], %s113_s24  ;;  %s356_s6 = scalar_lea.hbm %s537_s29, 64 }
  0x17   : > { %p357_p1 = scmp.ne.s32.totalorder %s537_s29, %s356_s6  ;;  %p358_p2 = pneg %p541_p12 }
  0x18   : > { %s361_s9 = scalar_lea.hbm %s639_s1, 256  ;;  %p362_p5 = scmp.lt.u32.totalorder %s537_s29, %s639_s1 }
  0x19   : > { %p359_p3 = pnand %p358_p2, %p357_p1  ;;  %p363_p7 = scmp.lt.u32.totalorder %s361_s9, %s356_s6 }
  0x1a   : > { %p365_p9 = scmp.lt.u32.totalorder %s356_s6, %s537_s29 }
  0x1b   : > { %p360_p4 = pneg %p359_p3  ;;  %p364_p8 = por %p363_p7, %p362_p5 }
  0x1d   : > { %p366_p13 = por %p365_p9, %p364_p8 }
  0x1f   : > { %p367_p0 = pnand %p366_p13, %p360_p4 }
  0x21   : > { %370 = shalt.err (!%p367_p0)
}
  0x22   : > { %s371_s17 = scalar_lea.vmem %s545_s3, 64  ;;  %s454_s18 = smov [#allocation3]  }
  0x23   : > { %p372_p1 = scmp.ne.s32.totalorder %s545_s3, %s371_s17  ;;  %s376_s20 = sshll.u32 %s454_s18, 4  ;;  %s377_s20 = int_to_ptr.vmem [resolvable:$false] %s376_s20 }
  0x24   : > { %s378_s24 = scalar_lea.vmem %s377_s20, 128  ;;  %p379_p10 = scmp.lt.s32.totalorder %s545_s3, %s377_s20 }
  0x25   : > { %p374_p3 = pnand %p372_p1, %p358_p2  ;;  %p380_p5 = scmp.lt.s32.totalorder %s378_s24, %s371_s17 }
  0x27   : > { %p375_p11 = pneg %p374_p3  ;;  %p381_p7 = por %p380_p5, %p379_p10 }
  0x29   : > { %p382_p8 = pnand %p381_p7, %p375_p11 }
  0x2b   : > { %385 = shalt.err (!%p382_p8)
}
  0x2c   : > { %316 = dma.hbm_to_vmem [thread:$0]  (!%p541_p12), %s537_s29, 64, %s545_s3, %s114_s5  }
  0x2d   : > { %p647_p13 = scmp.lt.s32.totalorder %s452_s14, 5  ;;  %p648_p0 = scmp.ge.s32.totalorder %s452_s14, 1 }
  0x2f   : > { %p131_p2 = pnand %p648_p0, %p647_p13 }
  0x30   : > { %s579_s25 = sand.u32 (!%p131_p2), 1, %s444_s12  }
  0x31   : > { %134 = sbr.rel (%p131_p2) target bundleno = 88 (0x58), region = 28  ;;  %s300_s26 = sshll.u32 (!%p131_p2), %s579_s25, 2 }
  0x32   : > { %s137_s27 = scalar_lea.sflag (!%p131_p2), [#allocation4], %s579_s25  ;;  %s140_s28 = scalar_lea.vmem (!%p131_p2), [#allocation3], %s300_s26 }
  0x38   : > { %431 = dma.done.wait (%p518_p6), %s137_s27, 64  }
  0x39   : > { %433 = vsyncadd (%p518_p6), %s137_s27, 4294967232  ;;  %v166_v0 = vlaneseq  ;;  %s163_s29 = sld [smem:[#allocation2]]  ;;  %v455_v2 = vmov 1983009808   ;;  %v164_v8 = vld [vmem:[%s140_s28] sm:$0xf] }
  0x3a   : > { %v199_v3 = vunpack.c.l.s4 %v455_v2  ;;  %vm186_vm0 = vcmask 1040384   ;;  %s160_s21 = scalar_lea.vmem [#allocation6], %s300_s26  ;;  %s308_s4 = sshll.u32 %s496_s0, 6 }
  0x3b   : > { %v167_v1 = vshrl.u32 %v166_v0, 7  ;;  %s223_s3 = sshll.u32 %s160_s21, 4  ;;  %s597_s7 = scalar_lea.hbm %s640_s2, %s308_s4  ;;  %s592_s3 = int_to_ptr.vmem [resolvable:$true] %s223_s3 }
  0x3c   : > { %v200_v9 = vunpack.c.0.s8 %v199_v3  ;;  %s209_s8 = scalar_lea.sflag [#allocation5], %s579_s25  ;;  %s386_s9 = scalar_lea.vmem %s592_s3, 64 }
  0x3d   : > { %v168_v4 = vsub.s32 1, %v167_v1  ;;  %v172_v5 = vsub.s32 3, %v167_v1  ;;  %v178_v6 = vsub.s32 0, %v167_v1  ;;  %v182_v7 = vsub.s32 2, %v167_v1  ;;  %p387_p6 = scmp.ne.s32.totalorder %s592_s3, %s386_s9  ;;  %p649_p10 = scmp.ne.s32.totalorder %s644_s22, 0 }
  0x3e   : > { %v203_v20 = vsub.s32 %v200_v9, %v167_v1  ;;  %s456_s0 = smov [#allocation6]  }
  0x3f   : > { %s191_s30 = ssub.f32 1.0, %s163_s29  ;;  %v169_v10 = vrot.slane %v164_v8, %v168_v4  ;;  %v173_v11 = vrot.slane %v164_v8, %v172_v5  ;;  %v179_v12 = vrot.slane %v164_v8, %v178_v6  ;;  %v183_v13 = vrot.slane %v164_v8, %v182_v7  ;;  %p388_p11 = pnand %p387_p6, %p649_p10 }
  0x40   : > { %v189_v17 = vstv %s163_s29  ;;  %s390_s10 = sshll.u32 %s456_s0, 4  ;;  %s391_s10 = int_to_ptr.vmem [resolvable:$false] %s390_s10 }
  0x41   : > { %v192_v14 = vstv %s191_s30  ;;  %v187_v15 = vsel %vm186_vm0, %v169_v10, %v179_v12  ;;  %v188_v16 = vsel %vm186_vm0, %v173_v11, %v183_v13  ;;  %v190_v21 = vmul.f32 %v189_v17, %v164_v8  ;;  %p389_p12 = pneg %p388_p11  ;;  %s392_s15 = scalar_lea.vmem %s391_s10, 128 }
  0x42   : > { %v193_v18 = vmul.f32 %v192_v14, %v187_v15  ;;  %v194_v19 = vmul.f32 %v192_v14, %v188_v16  ;;  %p393_p4 = scmp.lt.s32.totalorder %s592_s3, %s391_s10  ;;  %p394_p9 = scmp.lt.s32.totalorder %s392_s15, %s386_s9 }
  0x44   : > { %v197_v22 = vcombine.low %v193_v18, %v194_v19  ;;  %p395_p1 = por %p394_p9, %p393_p4 }
  0x46   : > { %v204_v23 = vrot.slane %v197_v22, %v203_v20  ;;  %p396_p3 = pnand %p395_p1, %p389_p12 }
  0x48   : > { %v206_v24 = vadd.f32 %v204_v23, %v190_v21 }
  0x4a   : > { %207 = vst [vmem:[%s160_s21] sm:$0xf] %v206_v24 }
  0x4b   : > { %399 = shalt.err (!%p396_p3)
}
  0x4c   : > { %s400_s17 = scalar_lea.hbm %s597_s7, 64  ;;  %s404_s24 = scalar_lea.hbm %s640_s2, 256 }
  0x4d   : > { %p401_p5 = scmp.ne.s32.totalorder %s597_s7, %s400_s17  ;;  %p405_p13 = scmp.lt.u32.totalorder %s597_s7, %s640_s2 }
  0x4e   : > { %p406_p0 = scmp.lt.u32.totalorder %s404_s24, %s400_s17  ;;  %p408_p6 = scmp.lt.u32.totalorder %s400_s17, %s597_s7 }
  0x4f   : > { %p402_p7 = pnand %p401_p5, %p649_p10 }
  0x50   : > { %p407_p2 = por %p406_p0, %p405_p13 }
  0x51   : > { %p403_p8 = pneg %p402_p7 }
  0x52   : > { %p409_p11 = por %p408_p6, %p407_p2 }
  0x54   : > { %p410_p12 = pnand %p409_p11, %p403_p8 }
  0x56   : > { %413 = shalt.err (!%p410_p12)
}
  0x57   : > { %311 = dma.vmem_to_hbm [thread:$0]  (%p649_p10), %s592_s3, 64, %s597_s7, %s209_s8  }
  0x58 PF: > { %p322_p4 = scmp.ge.s32.totalorder %s452_s14, 2  ;;  %s235_s27 = sand.u32 1, %s440_s11  }
  0x59   : > { %p650_p9 = scmp.ne.s32.totalorder %s645_s23, 0  ;;  %s236_s28 = scalar_lea.sflag [#allocation5], %s235_s27 }
  0x5b   : > { %p318_p1 = pnand %p322_p4, %p650_p9 }
  0x5d   : > { %435 = dma.done.wait (!%p318_p1), %s236_s28, 64  }
  0x5e   : > { %437 = vsyncadd (!%p318_p1), %s236_s28, 4294967232  ;;  %p16_p3 = scmp.ge.s32.totalorder %s500_s16, 6   ;;  %s651_s11 = smov %s444_s12 }
  0x5f   : > { %s652_s12 = smov %s448_s13  ;;  %s653_s13 = smov %s512_s19 }
  0x60   : > { %s654_s14 = smov %s500_s16  ;;  %18 = sbr.rel (!%p16_p3) target bundleno = 7 (0x7), region = 73 }
  0x67   :  { %241 = vsyncpa [#allocation4], 1 }
  0x68   :  { %243 = vsyncpa [#allocation4 + $0x1], 1 }
  0x69   :  { %244 = vsyncpa [#allocation5], 1 }
  0x6a   :  { %246 = vsyncpa [#allocation5 + $0x1], 1 }

</bundles_post_ra>
